<compile_context>
chip_gen: v7x
topology: tpu7x:2x2x1
jax: 0.10.0
libtpu: 0.0.40
codegen_flags: <defaults>
</compile_context>

<pallas_src>
import functools

import jax
import jax.numpy as jnp
import numpy as np
from jax.experimental import pallas as pl
from jax.experimental.pallas import tpu as pltpu  # noqa: F401  (TPU backend module)


def _conv3x3_kernel(x_ref, w_ref, b_ref, o_ref, *, stride, n, h_out, w_out):
    """3x3 conv as 9 shifted-window matmuls on the MXU.

    x_ref: (S, N, Hs, Ws, Cin)   space-to-depth padded input, S = stride**2, bf16
    w_ref: (3, 3, Cin, Cout)     bf16
    b_ref: (1, Cout)             f32
    o_ref: (N*h_out*w_out, Cout) f32   (sublane/lane aligned flat output slab)
    """
    c_in = x_ref.shape[-1]
    c_out = o_ref.shape[-1]
    m = n * h_out * w_out

    acc = jnp.zeros((m, c_out), dtype=jnp.float32)
    for kh in range(3):
        for kw in range(3):
            s_idx = (kh % stride) * stride + (kw % stride)
            r0 = kh // stride
            c0 = kw // stride
            # Contiguous static slice of one space-to-depth sub-grid.
            patch = x_ref[s_idx, :, r0:r0 + h_out, c0:c0 + w_out, :]
            acc = acc + jnp.dot(patch.reshape(m, c_in), w_ref[kh, kw],
                                preferred_element_type=jnp.float32)
    o_ref[...] = acc + b_ref[...]


def conv2d_3x3_pallas(x_nchw, w_oihw, bias, *, stride):
    """3x3 conv, padding=1. NCHW f32 in -> NHWC f32 out (N, Ho, Wo, Cout)."""
    n, c_in, h, w = x_nchw.shape
    c_out = w_oihw.shape[0]
    k, pad = 3, 1
    h_out = (h + 2 * pad - k) // stride + 1
    w_out = (w + 2 * pad - k) // stride + 1

    # Lane-align Cout (e.g. 160 -> 256); padded columns are zero and sliced off below.
    c_out_p = -(-c_out // 128) * 128

    # --- wrapper-side layout plumbing: bf16 cast + zero pad + space-to-depth ---
    x_nhwc = jnp.transpose(x_nchw, (0, 2, 3, 1)).astype(jnp.bfloat16)
    extra_h = (-(h + 2 * pad)) % stride
    extra_w = (-(w + 2 * pad)) % stride
    x_nhwc = jnp.pad(x_nhwc, ((0, 0), (pad, pad + extra_h),
                              (pad, pad + extra_w), (0, 0)))
    h_pad = h + 2 * pad + extra_h
    w_pad = w + 2 * pad + extra_w
    hs, ws = h_pad // stride, w_pad // stride
    x_s2d = x_nhwc.reshape(n, hs, stride, ws, stride, c_in)
    x_s2d = jnp.transpose(x_s2d, (2, 4, 0, 1, 3, 5))
    x_s2d = x_s2d.reshape(stride * stride, n, hs, ws, c_in)

    w_hwio = jnp.transpose(w_oihw, (2, 3, 1, 0)).astype(jnp.bfloat16)
    b2 = bias.astype(jnp.float32)
    if c_out_p != c_out:
        w_hwio = jnp.pad(w_hwio, ((0, 0), (0, 0), (0, 0), (0, c_out_p - c_out)))
        b2 = jnp.pad(b2, (0, c_out_p - c_out))
    b2 = b2.reshape(1, c_out_p)

    m = n * h_out * w_out
    kernel = functools.partial(_conv3x3_kernel, stride=stride, n=n,
                               h_out=h_out, w_out=w_out)
    cost = pl.CostEstimate(
        flops=2 * m * 9 * c_in * c_out_p,
        transcendentals=0,
        bytes_accessed=(x_s2d.size * 2 + w_hwio.size * 2
                        + b2.size * 4 + m * c_out_p * 4),
    )

    # Grid-less call: all operands live whole in VMEM (<3 MB), single kernel invocation.
    out_flat = pl.pallas_call(
        kernel,
        out_shape=jax.ShapeDtypeStruct((m, c_out_p), jnp.float32),
        cost_estimate=cost,
    )(x_s2d, w_hwio, b2)

    return out_flat.reshape(n, h_out, w_out, c_out_p)[..., :c_out]


def your_model_forward(xs, w3, b3, w4, b4):
    out1 = xs[0]
    out2 = xs[1]
    y3 = conv2d_3x3_pallas(xs[2], w3, b3, stride=2)   # (N, Ho, Wo, 160) NHWC
    y4 = conv2d_3x3_pallas(xs[3], w4, b4, stride=1)   # (N, Ho, Wo, 256) NHWC

    # Fused 2x nearest upsample + NHWC->NCHW (one XLA copy fusion, no jnp.repeat).
    n, ho, wo, c3 = y3.shape
    out3 = jnp.broadcast_to(y3[:, :, None, :, None, :], (n, ho, 2, wo, 2, c3))
    out3 = out3.reshape(n, 2 * ho, 2 * wo, c3)
    out3 = jnp.transpose(out3, (0, 3, 1, 2))

    out4 = jnp.transpose(y4, (0, 3, 1, 2))
    return out1, out2, out3, out4


def _conv_ref(x, w, b, stride):
    """Plain-JAX reference (PyTorch Conv2d semantics) on the same bf16-rounded values."""
    xb = x.astype(jnp.bfloat16).astype(jnp.float32)
    wb = w.astype(jnp.bfloat16).astype(jnp.float32)
    y = jax.lax.conv_general_dilated(
        xb, wb, window_strides=(stride, stride), padding=((1, 1), (1, 1)),
        dimension_numbers=("NCHW", "OIHW", "NCHW"))
    return y + b.reshape(1, -1, 1, 1)


def _upsample2x_ref(x):
    x = jnp.repeat(x, 2, axis=2)
    x = jnp.repeat(x, 2, axis=3)
    return x


if __name__ == "__main__":
    key = jax.random.PRNGKey(0)
    ks = jax.random.split(key, 8)
    N = 2

    # Small deterministic inputs; x[2] must have 128 channels, x[3] 512.
    x0 = jax.random.normal(ks[0], (N, 64, 8, 8), jnp.float32)
    x1 = jax.random.normal(ks[1], (N, 64, 4, 4), jnp.float32)
    x2 = jax.random.normal(ks[2], (N, 128, 8, 8), jnp.float32)
    x3 = jax.random.normal(ks[3], (N, 512, 4, 4), jnp.float32)

    # Deterministic synthetic parameters (PyTorch OIHW layout).
    w3 = jax.random.normal(ks[4], (160, 128, 3, 3), jnp.float32) * 0.05
    b3 = jax.random.normal(ks[5], (160,), jnp.float32) * 0.05
    w4 = jax.random.normal(ks[6], (256, 512, 3, 3), jnp.float32) * 0.05
    b4 = jax.random.normal(ks[7], (256,), jnp.float32) * 0.05

    out1, out2, out3, out4 = your_model_forward((x0, x1, x2, x3),
                                                w3, b3, w4, b4)
    jax.block_until_ready((out1, out2, out3, out4))

    # Shape checks (match PyTorch module semantics).
    assert out1.shape == (N, 64, 8, 8)
    assert out2.shape == (N, 64, 4, 4)
    assert out3.shape == (N, 160, 8, 8)   # conv s=2 (8->4) then 2x upsample (->8)
    assert out4.shape == (N, 256, 4, 4)

    # Numerical check against plain-JAX conv reference (same bf16-rounded operands).
    ref3 = _upsample2x_ref(_conv_ref(x2, w3, b3, stride=2))
    ref4 = _conv_ref(x3, w4, b4, stride=1)
    assert np.allclose(np.asarray(out3), np.asarray(ref3), rtol=1e-2, atol=1e-2)
    assert np.allclose(np.asarray(out4), np.asarray(ref4), rtol=1e-2, atol=1e-2)

    print("KERNEL_OK")
</pallas_src>

<mosaic_0001>
module attributes {stable_mosaic.version = 11 : i64} {
  func.func @_conv3x3_kernel(%arg0: memref<4x2x5x5x128xbf16, #tpu.memory_space<vmem>>, %arg1: memref<3x3x128x256xbf16, #tpu.memory_space<vmem>>, %arg2: memref<1x256xf32, #tpu.memory_space<vmem>>, %arg3: memref<32x256xf32, #tpu.memory_space<vmem>>) attributes {dimension_semantics = [], scalar_prefetch = 0 : i64, scratch_operands = 0 : i64, tpu.core_type = #tpu.core_type<tc>} {
    %cst = arith.constant 0.000000e+00 : f32
    %0 = vector.broadcast %cst : f32 to vector<32x256xf32>
    %c0 = arith.constant 0 : index
    %c0_0 = arith.constant 0 : index
    %c0_1 = arith.constant 0 : index
    %c0_2 = arith.constant 0 : index
    %c0_3 = arith.constant 0 : index
    %1 = vector.load %arg0[%c0, %c0_0, %c0_1, %c0_2, %c0_3] : memref<4x2x5x5x128xbf16, #tpu.memory_space<vmem>>, vector<1x2x4x4x128xbf16>
    %2 = vector.shape_cast %1 : vector<1x2x4x4x128xbf16> to vector<2x4x4x128xbf16>
    %3 = vector.shape_cast %2 : vector<2x4x4x128xbf16> to vector<32x128xbf16>
    %c0_4 = arith.constant 0 : index
    %c0_5 = arith.constant 0 : index
    %c0_6 = arith.constant 0 : index
    %c0_7 = arith.constant 0 : index
    %4 = vector.load %arg1[%c0_4, %c0_5, %c0_6, %c0_7] : memref<3x3x128x256xbf16, #tpu.memory_space<vmem>>, vector<1x1x128x256xbf16>
    %5 = vector.shape_cast %4 : vector<1x1x128x256xbf16> to vector<128x256xbf16>
    %cst_8 = arith.constant dense<0.000000e+00> : vector<32x256xf32>
    %6 = tpu.matmul %3, %5, %cst_8 {dimension_numbers = #tpu.dot_dimension_numbers<[1], [0], [0], [1], [0, 0, 1, 1], [], []>} : vector<32x128xbf16>, vector<128x256xbf16>, vector<32x256xf32> -> vector<32x256xf32>
    %7 = arith.addf %0, %6 : vector<32x256xf32>
    %c1 = arith.constant 1 : index
    %c0_9 = arith.constant 0 : index
    %c0_10 = arith.constant 0 : index
    %c0_11 = arith.constant 0 : index
    %c0_12 = arith.constant 0 : index
    %8 = vector.load %arg0[%c1, %c0_9, %c0_10, %c0_11, %c0_12] : memref<4x2x5x5x128xbf16, #tpu.memory_space<vmem>>, vector<1x2x4x4x128xbf16>
    %9 = vector.shape_cast %8 : vector<1x2x4x4x128xbf16> to vector<2x4x4x128xbf16>
    %10 = vector.shape_cast %9 : vector<2x4x4x128xbf16> to vector<32x128xbf16>
    %c0_13 = arith.constant 0 : index
    %c1_14 = arith.constant 1 : index
    %c0_15 = arith.constant 0 : index
    %c0_16 = arith.constant 0 : index
    %11 = vector.load %arg1[%c0_13, %c1_14, %c0_15, %c0_16] : memref<3x3x128x256xbf16, #tpu.memory_space<vmem>>, vector<1x1x128x256xbf16>
    %12 = vector.shape_cast %11 : vector<1x1x128x256xbf16> to vector<128x256xbf16>
    %cst_17 = arith.constant dense<0.000000e+00> : vector<32x256xf32>
    %13 = tpu.matmul %10, %12, %cst_17 {dimension_numbers = #tpu.dot_dimension_numbers<[1], [0], [0], [1], [0, 0, 1, 1], [], []>} : vector<32x128xbf16>, vector<128x256xbf16>, vector<32x256xf32> -> vector<32x256xf32>
    %14 = arith.addf %7, %13 : vector<32x256xf32>
    %c0_18 = arith.constant 0 : index
    %c0_19 = arith.constant 0 : index
    %c0_20 = arith.constant 0 : index
    %c1_21 = arith.constant 1 : index
    %c0_22 = arith.constant 0 : index
    %15 = vector.load %arg0[%c0_18, %c0_19, %c0_20, %c1_21, %c0_22] : memref<4x2x5x5x128xbf16, #tpu.memory_space<vmem>>, vector<1x2x4x4x128xbf16>
    %16 = vector.shape_cast %15 : vector<1x2x4x4x128xbf16> to vector<2x4x4x128xbf16>
    %17 = vector.shape_cast %16 : vector<2x4x4x128xbf16> to vector<32x128xbf16>
    %c0_23 = arith.constant 0 : index
    %c2 = arith.constant 2 : index
    %c0_24 = arith.constant 0 : index
    %c0_25 = arith.constant 0 : index
    %18 = vector.load %arg1[%c0_23, %c2, %c0_24, %c0_25] : memref<3x3x128x256xbf16, #tpu.memory_space<vmem>>, vector<1x1x128x256xbf16>
    %19 = vector.shape_cast %18 : vector<1x1x128x256xbf16> to vector<128x256xbf16>
    %cst_26 = arith.constant dense<0.000000e+00> : vector<32x256xf32>
    %20 = tpu.matmul %17, %19, %cst_26 {dimension_numbers = #tpu.dot_dimension_numbers<[1], [0], [0], [1], [0, 0, 1, 1], [], []>} : vector<32x128xbf16>, vector<128x256xbf16>, vector<32x256xf32> -> vector<32x256xf32>
    %21 = arith.addf %14, %20 : vector<32x256xf32>
    %c2_27 = arith.constant 2 : index
    %c0_28 = arith.constant 0 : index
    %c0_29 = arith.constant 0 : index
    %c0_30 = arith.constant 0 : index
    %c0_31 = arith.constant 0 : index
    %22 = vector.load %arg0[%c2_27, %c0_28, %c0_29, %c0_30, %c0_31] : memref<4x2x5x5x128xbf16, #tpu.memory_space<vmem>>, vector<1x2x4x4x128xbf16>
    %23 = vector.shape_cast %22 : vector<1x2x4x4x128xbf16> to vector<2x4x4x128xbf16>
    %24 = vector.shape_cast %23 : vector<2x4x4x128xbf16> to vector<32x128xbf16>
    %c1_32 = arith.constant 1 : index
    %c0_33 = arith.constant 0 : index
    %c0_34 = arith.constant 0 : index
    %c0_35 = arith.constant 0 : index
    %25 = vector.load %arg1[%c1_32, %c0_33, %c0_34, %c0_35] : memref<3x3x128x256xbf16, #tpu.memory_space<vmem>>, vector<1x1x128x256xbf16>
    %26 = vector.shape_cast %25 : vector<1x1x128x256xbf16> to vector<128x256xbf16>
    %cst_36 = arith.constant dense<0.000000e+00> : vector<32x256xf32>
    %27 = tpu.matmul %24, %26, %cst_36 {dimension_numbers = #tpu.dot_dimension_numbers<[1], [0], [0], [1], [0, 0, 1, 1], [], []>} : vector<32x128xbf16>, vector<128x256xbf16>, vector<32x256xf32> -> vector<32x256xf32>
    %28 = arith.addf %21, %27 : vector<32x256xf32>
    %c3 = arith.constant 3 : index
    %c0_37 = arith.constant 0 : index
    %c0_38 = arith.constant 0 : index
    %c0_39 = arith.constant 0 : index
    %c0_40 = arith.constant 0 : index
    %29 = vector.load %arg0[%c3, %c0_37, %c0_38, %c0_39, %c0_40] : memref<4x2x5x5x128xbf16, #tpu.memory_space<vmem>>, vector<1x2x4x4x128xbf16>
    %30 = vector.shape_cast %29 : vector<1x2x4x4x128xbf16> to vector<2x4x4x128xbf16>
    %31 = vector.shape_cast %30 : vector<2x4x4x128xbf16> to vector<32x128xbf16>
    %c1_41 = arith.constant 1 : index
    %c1_42 = arith.constant 1 : index
    %c0_43 = arith.constant 0 : index
    %c0_44 = arith.constant 0 : index
    %32 = vector.load %arg1[%c1_41, %c1_42, %c0_43, %c0_44] : memref<3x3x128x256xbf16, #tpu.memory_space<vmem>>, vector<1x1x128x256xbf16>
    %33 = vector.shape_cast %32 : vector<1x1x128x256xbf16> to vector<128x256xbf16>
    %cst_45 = arith.constant dense<0.000000e+00> : vector<32x256xf32>
    %34 = tpu.matmul %31, %33, %cst_45 {dimension_numbers = #tpu.dot_dimension_numbers<[1], [0], [0], [1], [0, 0, 1, 1], [], []>} : vector<32x128xbf16>, vector<128x256xbf16>, vector<32x256xf32> -> vector<32x256xf32>
    %35 = arith.addf %28, %34 : vector<32x256xf32>
    %c2_46 = arith.constant 2 : index
    %c0_47 = arith.constant 0 : index
    %c0_48 = arith.constant 0 : index
    %c1_49 = arith.constant 1 : index
    %c0_50 = arith.constant 0 : index
    %36 = vector.load %arg0[%c2_46, %c0_47, %c0_48, %c1_49, %c0_50] : memref<4x2x5x5x128xbf16, #tpu.memory_space<vmem>>, vector<1x2x4x4x128xbf16>
    %37 = vector.shape_cast %36 : vector<1x2x4x4x128xbf16> to vector<2x4x4x128xbf16>
    %38 = vector.shape_cast %37 : vector<2x4x4x128xbf16> to vector<32x128xbf16>
    %c1_51 = arith.constant 1 : index
    %c2_52 = arith.constant 2 : index
    %c0_53 = arith.constant 0 : index
    %c0_54 = arith.constant 0 : index
    %39 = vector.load %arg1[%c1_51, %c2_52, %c0_53, %c0_54] : memref<3x3x128x256xbf16, #tpu.memory_space<vmem>>, vector<1x1x128x256xbf16>
    %40 = vector.shape_cast %39 : vector<1x1x128x256xbf16> to vector<128x256xbf16>
    %cst_55 = arith.constant dense<0.000000e+00> : vector<32x256xf32>
    %41 = tpu.matmul %38, %40, %cst_55 {dimension_numbers = #tpu.dot_dimension_numbers<[1], [0], [0], [1], [0, 0, 1, 1], [], []>} : vector<32x128xbf16>, vector<128x256xbf16>, vector<32x256xf32> -> vector<32x256xf32>
    %42 = arith.addf %35, %41 : vector<32x256xf32>
    %c0_56 = arith.constant 0 : index
    %c0_57 = arith.constant 0 : index
    %c1_58 = arith.constant 1 : index
    %c0_59 = arith.constant 0 : index
    %c0_60 = arith.constant 0 : index
    %43 = vector.load %arg0[%c0_56, %c0_57, %c1_58, %c0_59, %c0_60] : memref<4x2x5x5x128xbf16, #tpu.memory_space<vmem>>, vector<1x2x4x4x128xbf16>
    %44 = vector.shape_cast %43 : vector<1x2x4x4x128xbf16> to vector<2x4x4x128xbf16>
    %45 = vector.shape_cast %44 : vector<2x4x4x128xbf16> to vector<32x128xbf16>
    %c2_61 = arith.constant 2 : index
    %c0_62 = arith.constant 0 : index
    %c0_63 = arith.constant 0 : index
    %c0_64 = arith.constant 0 : index
    %46 = vector.load %arg1[%c2_61, %c0_62, %c0_63, %c0_64] : memref<3x3x128x256xbf16, #tpu.memory_space<vmem>>, vector<1x1x128x256xbf16>
    %47 = vector.shape_cast %46 : vector<1x1x128x256xbf16> to vector<128x256xbf16>
    %cst_65 = arith.constant dense<0.000000e+00> : vector<32x256xf32>
    %48 = tpu.matmul %45, %47, %cst_65 {dimension_numbers = #tpu.dot_dimension_numbers<[1], [0], [0], [1], [0, 0, 1, 1], [], []>} : vector<32x128xbf16>, vector<128x256xbf16>, vector<32x256xf32> -> vector<32x256xf32>
    %49 = arith.addf %42, %48 : vector<32x256xf32>
    %c1_66 = arith.constant 1 : index
    %c0_67 = arith.constant 0 : index
    %c1_68 = arith.constant 1 : index
    %c0_69 = arith.constant 0 : index
    %c0_70 = arith.constant 0 : index
    %50 = vector.load %arg0[%c1_66, %c0_67, %c1_68, %c0_69, %c0_70] : memref<4x2x5x5x128xbf16, #tpu.memory_space<vmem>>, vector<1x2x4x4x128xbf16>
    %51 = vector.shape_cast %50 : vector<1x2x4x4x128xbf16> to vector<2x4x4x128xbf16>
    %52 = vector.shape_cast %51 : vector<2x4x4x128xbf16> to vector<32x128xbf16>
    %c2_71 = arith.constant 2 : index
    %c1_72 = arith.constant 1 : index
    %c0_73 = arith.constant 0 : index
    %c0_74 = arith.constant 0 : index
    %53 = vector.load %arg1[%c2_71, %c1_72, %c0_73, %c0_74] : memref<3x3x128x256xbf16, #tpu.memory_space<vmem>>, vector<1x1x128x256xbf16>
    %54 = vector.shape_cast %53 : vector<1x1x128x256xbf16> to vector<128x256xbf16>
    %cst_75 = arith.constant dense<0.000000e+00> : vector<32x256xf32>
    %55 = tpu.matmul %52, %54, %cst_75 {dimension_numbers = #tpu.dot_dimension_numbers<[1], [0], [0], [1], [0, 0, 1, 1], [], []>} : vector<32x128xbf16>, vector<128x256xbf16>, vector<32x256xf32> -> vector<32x256xf32>
    %56 = arith.addf %49, %55 : vector<32x256xf32>
    %c0_76 = arith.constant 0 : index
    %c0_77 = arith.constant 0 : index
    %c1_78 = arith.constant 1 : index
    %c1_79 = arith.constant 1 : index
    %c0_80 = arith.constant 0 : index
    %57 = vector.load %arg0[%c0_76, %c0_77, %c1_78, %c1_79, %c0_80] : memref<4x2x5x5x128xbf16, #tpu.memory_space<vmem>>, vector<1x2x4x4x128xbf16>
    %58 = vector.shape_cast %57 : vector<1x2x4x4x128xbf16> to vector<2x4x4x128xbf16>
    %59 = vector.shape_cast %58 : vector<2x4x4x128xbf16> to vector<32x128xbf16>
    %c2_81 = arith.constant 2 : index
    %c2_82 = arith.constant 2 : index
    %c0_83 = arith.constant 0 : index
    %c0_84 = arith.constant 0 : index
    %60 = vector.load %arg1[%c2_81, %c2_82, %c0_83, %c0_84] : memref<3x3x128x256xbf16, #tpu.memory_space<vmem>>, vector<1x1x128x256xbf16>
    %61 = vector.shape_cast %60 : vector<1x1x128x256xbf16> to vector<128x256xbf16>
    %cst_85 = arith.constant dense<0.000000e+00> : vector<32x256xf32>
    %62 = tpu.matmul %59, %61, %cst_85 {dimension_numbers = #tpu.dot_dimension_numbers<[1], [0], [0], [1], [0, 0, 1, 1], [], []>} : vector<32x128xbf16>, vector<128x256xbf16>, vector<32x256xf32> -> vector<32x256xf32>
    %63 = arith.addf %56, %62 : vector<32x256xf32>
    %c0_86 = arith.constant 0 : index
    %c0_87 = arith.constant 0 : index
    %64 = vector.load %arg2[%c0_86, %c0_87] : memref<1x256xf32, #tpu.memory_space<vmem>>, vector<1x256xf32>
    %65 = vector.broadcast %64 : vector<1x256xf32> to vector<32x256xf32>
    %66 = arith.addf %63, %65 : vector<32x256xf32>
    %c0_88 = arith.constant 0 : index
    %c0_89 = arith.constant 0 : index
    %67 = vector.load %arg3[%c0_88, %c0_89] : memref<32x256xf32, #tpu.memory_space<vmem>>, vector<32x256xf32>
    tpu.vector_store %arg3[%c0_88, %c0_89], %66 {strides = array<i32>} : memref<32x256xf32, #tpu.memory_space<vmem>>, vector<32x256xf32>,
    return
  }
}

</mosaic_0001>

<bundles_post_ra>
// kernel: tpu_custom_call.1
= control target key start
LH: loop header
LB: loop body
LE: loop exit
PB: predicated region body
PF: predicated region fallthrough
CT: control target
= control target key end

     0   :  { %8 = vsyncpa [#allocation3], 0  ;;  %s3413_s0 = inlined_call_operand.vmem [shape: bf16[4,2,5,5,128], index: 0, kind: input, shape index: {}]   ;;  %s3414_s1 = inlined_call_operand.hbm [shape: bf16[3,3,128,256], index: 1, kind: input, shape index: {}]   ;;  %s3415_s2 = inlined_call_operand.vmem [shape: f32[1,256], index: 2, kind: input, shape index: {}]   ;;  %s3416_s3 = inlined_call_operand.hbm [shape: f32[32,256], index: 3, kind: output, shape index: {}]  }
   0x1   :  { %9 = vsyncpa [#allocation4], 0  ;;  %s3112_s12 = smov [#allocation2]   ;;  %s3064_s16 = scalar_lea.hbm %s3414_s1, 18432 }
   0x2   :  { %s17_s13 = sshll.u32 %s3112_s12, 4  ;;  %p3065_p0 = scmp.ne.s32.totalorder %s3414_s1, %s3064_s16  ;;  %s18_s13 = int_to_ptr.vmem [resolvable:$true] %s17_s13 }
   0x3   :  { %p3068_p1 = scmp.lt.u32.totalorder %s3064_s16, %s3414_s1 }
   0x5   :  { %p3070_p2 = pnand %p3068_p1, %p3065_p0 }
   0x7   :  { %3073 = shalt.err (!%p3070_p2)
}
   0x8   :  { %s3074_s21 = scalar_lea.vmem %s18_s13, 18432  ;;  %p3079_p4 = scmp.lt.s32.totalorder %s18_s13, %s18_s13 }
   0x9   :  { %p3075_p3 = scmp.ne.s32.totalorder %s18_s13, %s3074_s21  ;;  %p3080_p5 = scmp.lt.s32.totalorder %s3074_s21, %s3074_s21 }
   0xb   :  { %p3081_p6 = por %p3080_p5, %p3079_p4 }
   0xd   :  { %p3082_p7 = pnand %p3081_p6, %p3075_p3 }
   0xf   :  { %3085 = shalt.err (!%p3082_p7)
}
  0x10   :  { %s3113_s22 = smov 128   ;;  %s3114_s23 = smov 8  }
  0x11   :  { %23 = dma.hbm_to_vmem [thread:$0]  %s3414_s1, 18432, %s18_s13, [#allocation3], %s3113_s22, %s3113_s22, %s3114_s23  }
  0x12   :  { %3108 = dma.done.wait [#allocation3], 18432  }
  0x13   :  { %3109 = vsyncadd [#allocation3], 4294948864  ;;  %v3115_v0 = vmov 0   ;;  %v2800_v1 = vld [vmem:[#allocation2 + $0x84] ss:$8 sps:$4 sm:$0xff]   ;;  %v93_v23 = vlaneseq }
  0x14   :  { %236 = vmatprep.mubr.bf16.mxu1 %v3115_v0  ;;  %1220 = vmatprep.mubr.bf16.mxu0 %v3115_v0  ;;  %v2802_v2 = vld [vmem:[#allocation2 + $0x204] ss:$8 sps:$4 sm:$0xff]   ;;  %v2804_v3 = vld [vmem:[#allocation2 + $0x80] ss:$8 sps:$4 sm:$0xff]   ;;  %v2806_v5 = vld [vmem:[#allocation2 + $0x94] ss:$8 sps:$4 sm:$0xff]  }
  0x15   :  { %204 = vmatprep.subr.bf16.mxu1 %v2800_v1  ;;  %v2805_v4 = vld [vmem:[#allocation2 + $0x200] ss:$8 sps:$4 sm:$0xff]   ;;  %1188 = vmatprep.subr.bf16.mxu0 %v2802_v2  ;;  %v2808_v6 = vld [vmem:[#allocation2 + $0x214] ss:$8 sps:$4 sm:$0xff]   ;;  %v2810_v7 = vld [vmem:[#allocation2 + $0x90] ss:$8 sps:$4 sm:$0xff]  }
  0x16   :  { %205 = vmatpush1.bf16.msra.mxu1 %v2804_v3  ;;  %1189 = vmatpush1.bf16.msra.mxu0 %v2805_v4  ;;  %v2811_v8 = vld [vmem:[#allocation2 + $0x210] ss:$8 sps:$4 sm:$0xff]   ;;  %v2812_v9 = vld [vmem:[#allocation2 + $0xa4] ss:$8 sps:$4 sm:$0xff]   ;;  %v2816_v11 = vld [vmem:[#allocation2 + $0xa0] ss:$8 sps:$4 sm:$0xff]  }
  0x17   :  { %206 = vmatprep.subr.bf16.mxu1 %v2806_v5  ;;  %1190 = vmatprep.subr.bf16.mxu0 %v2808_v6  ;;  %v2814_v10 = vld [vmem:[#allocation2 + $0x224] ss:$8 sps:$4 sm:$0xff]   ;;  %v2817_v12 = vld [vmem:[#allocation2 + $0x220] ss:$8 sps:$4 sm:$0xff]   ;;  %v2818_v13 = vld [vmem:[#allocation2 + $0xb4] ss:$8 sps:$4 sm:$0xff]  }
  0x18   :  { %v2820_v14 = vld [vmem:[#allocation2 + $0x234] ss:$8 sps:$4 sm:$0xff]   ;;  %v2822_v15 = vld [vmem:[#allocation2 + $0xb0] ss:$8 sps:$4 sm:$0xff]   ;;  %v2824_v17 = vld [vmem:[#allocation2 + $0xc4] ss:$8 sps:$4 sm:$0xff]  }
  0x19   :  { %v2823_v16 = vld [vmem:[#allocation2 + $0x230] ss:$8 sps:$4 sm:$0xff]   ;;  %v2826_v18 = vld [vmem:[#allocation2 + $0x244] ss:$8 sps:$4 sm:$0xff]   ;;  %v2828_v19 = vld [vmem:[#allocation2 + $0xc0] ss:$8 sps:$4 sm:$0xff]  }
  0x1a   :  { %207 = vmatpush1.bf16.msra.mxu1 %v2810_v7  ;;  %1191 = vmatpush1.bf16.msra.mxu0 %v2811_v8  ;;  %v2829_v20 = vld [vmem:[#allocation2 + $0x240] ss:$8 sps:$4 sm:$0xff]   ;;  %v3116_v21 = vmov 1983009808   ;;  %v2830_v24 = vld [vmem:[#allocation2 + $0xd4] ss:$8 sps:$4 sm:$0xff]  }
  0x1b   :  { %208 = vmatprep.subr.bf16.mxu1 %v2812_v9  ;;  %1192 = vmatprep.subr.bf16.mxu0 %v2814_v10  ;;  %v91_v22 = vunpack.c.l.s4 %v3116_v21  ;;  %v2832_v25 = vld [vmem:[#allocation2 + $0x254] ss:$8 sps:$4 sm:$0xff]   ;;  %v2834_v26 = vld [vmem:[#allocation2 + $0xd0] ss:$8 sps:$4 sm:$0xff]   ;;  %v3154_v28 = vshrl.u32 %v93_v23, 7 }
  0x1c   :  { %v2835_v29 = vld [vmem:[#allocation2 + $0x250] ss:$8 sps:$4 sm:$0xff]   ;;  %v2836_v30 = vld [vmem:[#allocation2 + $0xe4] ss:$8 sps:$4 sm:$0xff]   ;;  %v2840_v32 = vld [vmem:[#allocation2 + $0xe0] ss:$8 sps:$4 sm:$0xff]  }
  0x1d   :  { %v92_v27 = vunpack.c.0.s8 %v91_v22  ;;  %v2838_v31 = vld [vmem:[#allocation2 + $0x264] ss:$8 sps:$4 sm:$0xff]   ;;  %v2841_v33 = vld [vmem:[#allocation2 + $0x260] ss:$8 sps:$4 sm:$0xff]   ;;  %v2842_v34 = vld [vmem:[#allocation2 + $0xf4] ss:$8 sps:$4 sm:$0xff]  }
  0x1e   :  { %209 = vmatpush1.bf16.msra.mxu1 %v2816_v11  ;;  %1193 = vmatpush1.bf16.msra.mxu0 %v2817_v12  ;;  %v2844_v35 = vld [vmem:[#allocation2 + $0x274] ss:$8 sps:$4 sm:$0xff]   ;;  %v3040_v37 = vld.sshfl [vmem:[%s3413_s0 + $0x28] sm:$0xf pattern:$0x76325410] }
  0x1f   :  { %210 = vmatprep.subr.bf16.mxu1 %v2818_v13  ;;  %1194 = vmatprep.subr.bf16.mxu0 %v2820_v14  ;;  %v3157_v36 = vsub.s32 %v92_v27, %v3154_v28  ;;  %v3041_v38 = vld.sshfl [vmem:[%s3413_s0 + $0x30] sm:$0xf pattern:$0x76325410]  ;;  %v2850_v43 = vld [vmem:[#allocation2 + $0x4] ss:$8 sps:$4 sm:$0xff]  }
  0x20   :  { %v2846_v39 = vld [vmem:[#allocation2 + $0xf0] ss:$8 sps:$4 sm:$0xff]   ;;  %v3043_v42 = vld.sshfl [vmem:[%s3413_s0 + $0x80] sm:$0xf pattern:$0x76325410]  ;;  %v104_v47 = vcombine.low %v3040_v37, %v3041_v38 }
  0x21   :  { %v2847_v40 = vld [vmem:[#allocation2 + $0x270] ss:$8 sps:$4 sm:$0xff]   ;;  %v2853_v44 = vld [vmem:[#allocation2 + $0x284] ss:$8 sps:$4 sm:$0xff]   ;;  %v2848_v45 = vld [vmem:[#allocation2] ss:$8 sps:$4 sm:$0xff]  }
  0x22   :  { %211 = vmatpush1.bf16.msra.mxu1 %v2822_v15  ;;  %1195 = vmatpush1.bf16.msra.mxu0 %v2823_v16  ;;  %v3042_v41 = vld.sshfl [vmem:[%s3413_s0 + $0x78] sm:$0xf pattern:$0x76325410]  ;;  %v2851_v46 = vld [vmem:[#allocation2 + $0x280] ss:$8 sps:$4 sm:$0xff]  }
  0x23   :  { %212 = vmatprep.subr.bf16.mxu1 %v2824_v17  ;;  %1196 = vmatprep.subr.bf16.mxu0 %v2826_v18  ;;  %v1088_v48 = vcombine.low %v3042_v41, %v3043_v42  ;;  %v2860_v49 = vld [vmem:[#allocation2 + $0x14] ss:$8 sps:$4 sm:$0xff]   ;;  %v2858_v51 = vld [vmem:[#allocation2 + $0x10] ss:$8 sps:$4 sm:$0xff]   ;;  %v2866_v53 = vld [vmem:[#allocation2 + $0x24] ss:$8 sps:$4 sm:$0xff]  }
  0x24   :  { %v2863_v50 = vld [vmem:[#allocation2 + $0x294] ss:$8 sps:$4 sm:$0xff]   ;;  %v2861_v52 = vld [vmem:[#allocation2 + $0x290] ss:$8 sps:$4 sm:$0xff]   ;;  %v2869_v54 = vld [vmem:[#allocation2 + $0x2a4] ss:$8 sps:$4 sm:$0xff]  }
  0x25   :  { %v2864_v55 = vld [vmem:[#allocation2 + $0x20] ss:$8 sps:$4 sm:$0xff]   ;;  %v2872_v57 = vld [vmem:[#allocation2 + $0x34] ss:$8 sps:$4 sm:$0xff]   ;;  %v2870_v59 = vld [vmem:[#allocation2 + $0x30] ss:$8 sps:$4 sm:$0xff]  }
  0x26   :  { %213 = vmatpush1.bf16.msra.mxu1 %v2828_v19  ;;  %1197 = vmatpush1.bf16.msra.mxu0 %v2829_v20  ;;  %v2867_v56 = vld [vmem:[#allocation2 + $0x2a0] ss:$8 sps:$4 sm:$0xff]   ;;  %v2875_v58 = vld [vmem:[#allocation2 + $0x2b4] ss:$8 sps:$4 sm:$0xff]   ;;  %v2873_v60 = vld [vmem:[#allocation2 + $0x2b0] ss:$8 sps:$4 sm:$0xff]  }
  0x27   :  { %214 = vmatprep.subr.bf16.mxu1 %v2830_v24  ;;  %1198 = vmatprep.subr.bf16.mxu0 %v2832_v25  ;;  %v2878_v61 = vld [vmem:[#allocation2 + $0x44] ss:$8 sps:$4 sm:$0xff]   ;;  %v3044_v63 = vld.sshfl [vmem:[%s3413_s0 + $0x3c] sm:$0xf pattern:$0x76325410] }
  0x28   :  { %v2881_v62 = vld [vmem:[#allocation2 + $0x2c4] ss:$8 sps:$4 sm:$0xff]   ;;  %v2876_v2 = vld [vmem:[#allocation2 + $0x40] ss:$8 sps:$4 sm:$0xff]   ;;  %v2884_v6 = vld [vmem:[#allocation2 + $0x54] ss:$8 sps:$4 sm:$0xff]  }
  0x29   :  { %v3045_v1 = vld.sshfl [vmem:[%s3413_s0 + $0x44] sm:$0xf pattern:$0x76325410]  ;;  %v2887_v7 = vld [vmem:[#allocation2 + $0x2d4] ss:$8 sps:$4 sm:$0xff]  }
  0x2a   :  { %215 = vmatpush1.bf16.msra.mxu1 %v2834_v26  ;;  %1199 = vmatpush1.bf16.msra.mxu0 %v2835_v29  ;;  %v2879_v3 = vld [vmem:[#allocation2 + $0x2c0] ss:$8 sps:$4 sm:$0xff]   ;;  %v3046_v4 = vld.sshfl [vmem:[%s3413_s0 + $0x8c] sm:$0xf pattern:$0x76325410]  ;;  %v121_v8 = vcombine.low %v3044_v63, %v3045_v1 }
  0x2b   :  { %216 = vmatprep.subr.bf16.mxu1 %v2836_v30  ;;  %1200 = vmatprep.subr.bf16.mxu0 %v2838_v31  ;;  %v3047_v5 = vld.sshfl [vmem:[%s3413_s0 + $0x94] sm:$0xf pattern:$0x76325410]  ;;  %vm514_vm0 = vsmask.f32 1280 }
  0x2c   :  { %vm515_vm1 = vsmask.f32 3336  ;;  %vm517_vm2 = vsmask.f32 5392  ;;  %v2882_v9 = vld [vmem:[#allocation2 + $0x50] ss:$8 sps:$4 sm:$0xff]   ;;  %v1105_v11 = vcombine.low %v3046_v4, %v3047_v5 }
  0x2d   :  { %v2885_v10 = vld [vmem:[#allocation2 + $0x2d0] ss:$8 sps:$4 sm:$0xff]   ;;  %v2890_v12 = vld [vmem:[#allocation2 + $0x64] ss:$8 sps:$4 sm:$0xff]   ;;  %vm519_vm3 = vsmask.f32 7448  ;;  %vm3197_vm4 = vmor %vm514_vm0, %vm515_vm1 }
  0x2e   :  { %217 = vmatpush1.bf16.msra.mxu1 %v2840_v32  ;;  %1201 = vmatpush1.bf16.msra.mxu0 %v2841_v33  ;;  %v2893_v13 = vld [vmem:[#allocation2 + $0x2e4] ss:$8 sps:$4 sm:$0xff]   ;;  %v2888_v14 = vld [vmem:[#allocation2 + $0x60] ss:$8 sps:$4 sm:$0xff]   ;;  %v2900_v17 = vld [vmem:[#allocation2 + $0x74] ss:$8 sps:$4 sm:$0xff]  }
  0x2f   :  { %218 = vmatprep.subr.bf16.mxu1 %v2842_v34  ;;  %1202 = vmatprep.subr.bf16.mxu0 %v2844_v35  ;;  %v2891_v15 = vld [vmem:[#allocation2 + $0x2e0] ss:$8 sps:$4 sm:$0xff]   ;;  %v2903_v18 = vld [vmem:[#allocation2 + $0x2f4] ss:$8 sps:$4 sm:$0xff]   ;;  %v2898_v31 = vld [vmem:[#allocation2 + $0x70] ss:$8 sps:$4 sm:$0xff]  }
  0x30   :  { %v3189_v16 = vld.sshfl [vmem:[%s3413_s0] sm:$0xf pattern:$0x76325410]  ;;  %v2901_v32 = vld [vmem:[#allocation2 + $0x2f0] ss:$8 sps:$4 sm:$0xff]   ;;  %vm3213_vm5 = vmor %vm3197_vm4, %vm517_vm2 }
  0x31   :  { %v3049_v19 = vld.sshfl [vmem:[%s3413_s0 + $0x8] sm:$0xf pattern:$0x76325410]  ;;  %vm3223_vm6 = vmor %vm3213_vm5, %vm519_vm3  ;;  %v2914_v5 = vld [vmem:[#allocation2 + $0x114] ss:$8 sps:$4 sm:$0xff]  }
  0x32   :  { %219 = vmatpush1.bf16.msra.mxu1 %v2846_v39  ;;  %1203 = vmatpush1.bf16.msra.mxu0 %v2847_v40  ;;  %v2608_v21 = vld.sshfl [vmem:[%s3413_s0 + $0x50] sm:$0x13 pattern:$0x76325410]  ;;  %v2906_v39 = vld [vmem:[#allocation2 + $0x104] ss:$8 sps:$4 sm:$0xff]  }
  0x33   :  { %381 = vmatprep.subr.bf16.mxu1 %v2850_v43  ;;  %1574 = vmatprep.subr.bf16.mxu0 %v2853_v44  ;;  %v2609_v22 = vld.sshfl [vmem:[%s3413_s0 + $0x54] sm:$0x13 pattern:$0x76325410]  ;;  %v1272_v23 = vcombine.high %v2608_v21, %v2608_v21  ;;  %v1330_v24 = vshrl.u32 %v2608_v21, 16  ;;  %v1333_v25 = vshll.u32 %v2608_v21, 16 }
  0x34   :  { %v2610_v26 = vld.sshfl [vmem:[%s3413_s0 + $0x58] sm:$0x13 pattern:$0x76325410]  ;;  %v1280_v27 = vcombine.high %v2609_v22, %v2609_v22  ;;  %v1344_v29 = vshrl.u32 %v2609_v22, 16  ;;  %v1347_v30 = vshll.u32 %v2609_v22, 16 }
  0x35   :  { %237 = vmatmul.mubr.bf16.vlgmr.msra.gmra.mrb[0].mxu1 %v104_v47  ;;  %1221 = vmatmul.mubr.bf16.vlgmr.msra.gmra.mrb[0].mxu0 %v1088_v48  ;;  %v2611_v34 = vld.sshfl [vmem:[%s3413_s0 + $0x5c] sm:$0x13 pattern:$0x76325410]  ;;  %v1288_v35 = vcombine.high %v2610_v26, %v2610_v26  ;;  %v1332_v37 = vrot.slane %v1330_v24, 6  ;;  %v1335_v38 = vrot.slane %v1333_v25, 7 }
  0x36   :  { %382 = vmatpush1.bf16.msra.mxu1 %v2848_v45  ;;  %1575 = vmatpush1.bf16.msra.mxu0 %v2851_v46  ;;  %v1296_v40 = vcombine.high %v2611_v34, %v2611_v34  ;;  %v1339_v41 = vshll.u32 %v1272_v23, 16  ;;  %v1346_v42 = vrot.slane %v1344_v29, 6  ;;  %v2909_v43 = vld [vmem:[#allocation2 + $0x304] ss:$8 sps:$4 sm:$0xff]   ;;  %v1349_v45 = vrot.slane %v1347_v30, 7 }
  0x37   :  { %383 = vmatprep.subr.bf16.mxu1 %v2860_v49  ;;  %1576 = vmatprep.subr.bf16.mxu0 %v2863_v50  ;;  %v1336_v44 = vor.u32 %v1335_v38, %v1332_v37  ;;  %v1353_v46 = vshll.u32 %v1280_v27, 16  ;;  %v1358_v47 = vshrl.u32 %v2610_v26, 16  ;;  %v1361_v49 = vshll.u32 %v2610_v26, 16  ;;  %v2907_v21 = vld [vmem:[#allocation2 + $0x300] ss:$8 sps:$4 sm:$0xff]  }
  0x38   :  { %246 = vmatprep.mubr.bf16.mxu1 %v3115_v0  ;;  %1230 = vmatprep.mubr.bf16.mxu0 %v3115_v0  ;;  %v1341_v48 = vrot.slane %v1339_v41, 7  ;;  %v1367_v50 = vshll.u32 %v1288_v35, 16  ;;  %v1381_v63 = vshll.u32 %v1296_v40, 16  ;;  %v2917_v22 = vld [vmem:[#allocation2 + $0x314] ss:$8 sps:$4 sm:$0xff]  }
  0x39   :  { %v2924_v24 = vld [vmem:[#allocation2 + $0x130] ss:$8 sps:$4 sm:$0xff]   ;;  %v2932_v25 = vld [vmem:[#allocation2 + $0x144] ss:$8 sps:$4 sm:$0xff]   ;;  %v2930_v29 = vld [vmem:[#allocation2 + $0x140] ss:$8 sps:$4 sm:$0xff]  }
  0x3a   :  { %384 = vmatpush1.bf16.msra.mxu1 %v2858_v51  ;;  %1577 = vmatpush1.bf16.msra.mxu0 %v2861_v52  ;;  %v1372_v51 = vshrl.u32 %v2611_v34, 16  ;;  %v2915_v26 = vld [vmem:[#allocation2 + $0x310] ss:$8 sps:$4 sm:$0xff]   ;;  %v2923_v27 = vld [vmem:[#allocation2 + $0x324] ss:$8 sps:$4 sm:$0xff]  }
  0x3b   :  { %385 = vmatprep.subr.bf16.mxu1 %v2866_v53  ;;  %1578 = vmatprep.subr.bf16.mxu0 %v2869_v54  ;;  %v1337_v53 = vrot.slane %v1336_v44, 2  ;;  %v1350_v54 = vor.u32 %v1349_v45, %v1346_v42  ;;  %v3050_v30 = vld.sshfl [vmem:[%s3413_s0 + $0x14] sm:$0xf pattern:$0x76325410] }
  0x3c   :  { %v2612_v33 = vld.sshfl [vmem:[%s3413_s0 + $0x64] sm:$0x13 pattern:$0x76325410]  ;;  %v2921_v38 = vld [vmem:[#allocation2 + $0x320] ss:$8 sps:$4 sm:$0xff]  }
  0x3d   :  { %247 = vmatmul.mubr.bf16.gmra.mrb[4].mxu1 %v121_v8  ;;  %1231 = vmatmul.mubr.bf16.gmra.mrb[4].mxu0 %v1105_v11  ;;  %v1342_v1 = vsel %vm3223_vm6, %v1337_v53, %v1341_v48  ;;  %v2912_v11 = vld [vmem:[#allocation2 + $0x110] ss:$8 sps:$4 sm:$0xff]   ;;  %v1304_v35 = vcombine.high %v2612_v33, %v2612_v33  ;;  %v1386_v37 = vshrl.u32 %v2612_v33, 16  ;;  %v1389_v41 = vshll.u32 %v2612_v33, 16  ;;  %v2929_v48 = vld [vmem:[#allocation2 + $0x334] ss:$8 sps:$4 sm:$0xff]  }
  0x3e   :  { %386 = vmatpush1.bf16.msra.mxu1 %v2864_v55  ;;  %1579 = vmatpush1.bf16.msra.mxu0 %v2867_v56  ;;  %v1355_v55 = vrot.slane %v1353_v46, 7  ;;  %v1360_v56 = vrot.slane %v1358_v47, 6  ;;  %v2615_v44 = vld.sshfl [vmem:[%s3413_s0 + $0x70] sm:$0x13 pattern:$0x76325410] }
  0x3f   :  { %387 = vmatprep.subr.bf16.mxu1 %v2872_v57  ;;  %1580 = vmatprep.subr.bf16.mxu0 %v2875_v58  ;;  %v281_v57 = vcombine.low %v3189_v16, %v3049_v19  ;;  %v1363_v58 = vrot.slane %v1361_v49, 7  ;;  %v2926_v19 = vld [vmem:[#allocation2 + $0x134] ss:$8 sps:$4 sm:$0xff]   ;;  %v1388_v46 = vrot.slane %v1386_v37, 6  ;;  %v1395_v47 = vshll.u32 %v1304_v35, 16 }
  0x40   :  { %413 = vmatprep.mubr.bf16.mxu1 %v3115_v0  ;;  %1606 = vmatprep.mubr.bf16.mxu0 %v3115_v0  ;;  %v1328_v49 = vcombine.high %v2615_v44, %v2615_v44  ;;  %v2530_v35 = vld.sshfl [vmem:[%s3413_s0 + $0x8] sm:$0x13 pattern:$0x76325410] }
  0x42   :  { %388 = vmatpush1.bf16.msra.mxu1 %v2870_v59  ;;  %1581 = vmatpush1.bf16.msra.mxu0 %v2873_v60  ;;  %v1374_v59 = vrot.slane %v1372_v51, 6  ;;  %v1375_v60 = vshll.u32 %v2611_v34, 16  ;;  %v2613_v34 = vld.sshfl [vmem:[%s3413_s0 + $0x68] sm:$0x13 pattern:$0x76325410] }
  0x43   :  { %389 = vmatprep.subr.bf16.mxu1 %v2878_v61  ;;  %1582 = vmatprep.subr.bf16.mxu0 %v2881_v62  ;;  %v2904_v61 = vld [vmem:[#allocation2 + $0x100] ss:$8 sps:$4 sm:$0xff]   ;;  %v1351_v62 = vrot.slane %v1350_v54, 2  ;;  %v1312_v40 = vcombine.high %v2613_v34, %v2613_v34  ;;  %v1400_v42 = vshrl.u32 %v2613_v34, 16  ;;  %v1403_v53 = vshll.u32 %v2613_v34, 16 }
  0x44   :  { %v1377_v4 = vrot.slane %v1375_v60, 7  ;;  %v2936_v54 = vld [vmem:[#allocation2 + $0x150] ss:$8 sps:$4 sm:$0xff]   ;;  %v2944_v60 = vld [vmem:[#allocation2 + $0x164] ss:$8 sps:$4 sm:$0xff]  }
  0x45   :  { %v1402_v51 = vrot.slane %v1400_v42, 6 }
  0x46   :  { %390 = vmatpush1.bf16.msra.mxu1 %v2876_v2  ;;  %1583 = vmatpush1.bf16.msra.mxu0 %v2879_v3  ;;  %v1364_v2 = vor.u32 %v1363_v58, %v1360_v56  ;;  %v1369_v3 = vrot.slane %v1367_v50, 7  ;;  %v1378_v8 = vor.u32 %v1377_v4, %v1374_v59  ;;  %v1391_v50 = vrot.slane %v1389_v41, 7  ;;  %v2927_v59 = vld [vmem:[#allocation2 + $0x330] ss:$8 sps:$4 sm:$0xff]  }
  0x47   :  { %391 = vmatprep.subr.bf16.mxu1 %v2884_v6  ;;  %1584 = vmatprep.subr.bf16.mxu0 %v2887_v7  ;;  %v1356_v6 = vsel %vm3223_vm6, %v1351_v62, %v1355_v55  ;;  %v1397_v55 = vrot.slane %v1395_v47, 7  ;;  %v1409_v56 = vshll.u32 %v1312_v40, 16  ;;  %v1405_v62 = vrot.slane %v1403_v53, 7 }
  0x48   :  { %v1365_v7 = vrot.slane %v1364_v2, 2  ;;  %v2935_v2 = vld [vmem:[#allocation2 + $0x344] ss:$8 sps:$4 sm:$0xff]   ;;  %v473_v40 = vcombine.high %v2530_v35, %v2530_v35 }
  0x4a   :  { %392 = vmatpush1.bf16.msra.mxu1 %v2882_v9  ;;  %1585 = vmatpush1.bf16.msra.mxu0 %v2885_v10  ;;  %v1383_v9 = vrot.slane %v1381_v63, 7  ;;  %v1458_v10 = vcombine.low %v1342_v1, %v1356_v6  ;;  %v1428_v1 = vshrl.u32 %v2615_v44, 16  ;;  %v2942_v6 = vld [vmem:[#allocation2 + $0x160] ss:$8 sps:$4 sm:$0xff]  }
  0x4b   :  { %393 = vmatprep.subr.bf16.mxu1 %v2890_v12  ;;  %1586 = vmatprep.subr.bf16.mxu0 %v2893_v13  ;;  %v1370_v12 = vsel %vm3223_vm6, %v1365_v7, %v1369_v3  ;;  %v1379_v13 = vrot.slane %v1378_v8, 2  ;;  %v1406_v8 = vor.u32 %v1405_v62, %v1402_v51  ;;  %v2947_v51 = vld [vmem:[#allocation2 + $0x364] ss:$8 sps:$4 sm:$0xff]  }
  0x4e   :  { %394 = vmatpush1.bf16.msra.mxu1 %v2888_v14  ;;  %1587 = vmatpush1.bf16.msra.mxu0 %v2891_v15  ;;  %v2920_v14 = vld [vmem:[#allocation2 + $0x124] ss:$8 sps:$4 sm:$0xff]   ;;  %v1384_v15 = vsel %vm3223_vm6, %v1379_v13, %v1383_v9  ;;  %v1411_v9 = vrot.slane %v1409_v56, 7  ;;  %v553_v56 = vshll.u32 %v2530_v35, 16 }
  0x4f   :  { %395 = vmatprep.subr.bf16.mxu1 %v2900_v17  ;;  %1588 = vmatprep.subr.bf16.mxu0 %v2903_v18  ;;  %v1459_v16 = vcombine.low %v1370_v12, %v1384_v15  ;;  %v1466_v17 = vrot.slane %v1458_v10, %v3157_v36  ;;  %v2918_v18 = vld [vmem:[#allocation2 + $0x120] ss:$8 sps:$4 sm:$0xff]   ;;  %v1430_v10 = vrot.slane %v1428_v1, 6  ;;  %v559_v1 = vshll.u32 %v473_v40, 16 }
  0x50   :  { %v2933_v15 = vld [vmem:[#allocation2 + $0x340] ss:$8 sps:$4 sm:$0xff]   ;;  %v2533_v40 = vld.sshfl [vmem:[%s3413_s0 + $0x18] sm:$0x13 pattern:$0x76325410] }
  0x51   :  { %v1473_v20 = vrot.slane %v1459_v16, %v3157_v36 }
  0x52   :  { %396 = vmatpush1.bf16.msra.mxu1 %v2898_v31  ;;  %1589 = vmatpush1.bf16.msra.mxu0 %v2901_v32  ;;  %v3051_v31 = vld.sshfl [vmem:[%s3413_s0 + $0x1c] sm:$0xf pattern:$0x76325410] }
  0x53   :  { %766 = vmatprep.subr.bf16.mxu1 %v2906_v39  ;;  %1785 = vmatprep.subr.bf16.mxu0 %v2909_v43  ;;  %v1474_v23 = vcombine.low %v1466_v17, %v1473_v20  ;;  %v2938_v32 = vld [vmem:[#allocation2 + $0x154] ss:$8 sps:$4 sm:$0xff]   ;;  %v2614_v39 = vld.sshfl [vmem:[%s3413_s0 + $0x6c] sm:$0x13 pattern:$0x76325410]  ;;  %v298_v43 = vcombine.low %v3050_v30, %v3051_v31 }
  0x54   :  { %v1320_v45 = vcombine.high %v2614_v39, %v2614_v39  ;;  %v1417_v58 = vshll.u32 %v2614_v39, 16  ;;  %v1407_v17 = vrot.slane %v1406_v8, 2  ;;  %v2955_v8 = vld [vmem:[#allocation2 + $0x374] ss:$8 sps:$4 sm:$0xff]  }
  0x55   :  { %414 = vmatmul.mubr.bf16.vlgmr.msra.gmra.mrb[0].mxu1 %v281_v57  ;;  %1607 = vmatmul.mubr.bf16.vlgmr.msra.gmra.mrb[0].mxu0 %v1474_v23  ;;  %v1414_v57 = vshrl.u32 %v2614_v39, 16  ;;  %v2950_v23 = vld [vmem:[#allocation2 + $0x170] ss:$8 sps:$4 sm:$0xff]  }
  0x56   :  { %767 = vmatpush1.bf16.msra.mxu1 %v2904_v61  ;;  %423 = vmatprep.mubr.bf16.mxu1 %v3115_v0  ;;  %v1392_v61 = vor.u32 %v1391_v50, %v1388_v46  ;;  %v1423_v63 = vshll.u32 %v1320_v45, 16  ;;  %v1419_v4 = vrot.slane %v1417_v58, 7  ;;  %v2531_v39 = vld.sshfl [vmem:[%s3413_s0 + $0xc] sm:$0x13 pattern:$0x76325410] }
  0x57   :  { %768 = vmatprep.subr.bf16.mxu1 %v2914_v5  ;;  %1786 = vmatpush1.bf16.msra.mxu0 %v2907_v21  ;;  %v1416_v3 = vrot.slane %v1414_v57, 6  ;;  %v1431_v5 = vshll.u32 %v2615_v44, 16  ;;  %v481_v45 = vcombine.high %v2531_v39, %v2531_v39 }
  0x58   :  { %1616 = vmatprep.mubr.bf16.mxu0 %v3115_v0  ;;  %1787 = vmatprep.subr.bf16.mxu0 %v2917_v22  ;;  %v1393_v7 = vrot.slane %v1392_v61, 2  ;;  %v1425_v12 = vrot.slane %v1423_v63, 7  ;;  %v3052_v61 = vld.sshfl [vmem:[%s3413_s0 + $0x4] sm:$0xf pattern:$0x76325410] }
  0x59   :  { %v1433_v13 = vrot.slane %v1431_v5, 7  ;;  %v555_v63 = vrot.slane %v553_v56, 7  ;;  %v2972_v56 = vld [vmem:[#allocation2 + $0x1a4] ss:$8 sps:$4 sm:$0xff]  }
  0x5a   :  { %769 = vmatpush1.bf16.msra.mxu1 %v2912_v11  ;;  %v1420_v11 = vor.u32 %v1419_v4, %v1416_v3  ;;  %v1398_v16 = vsel %vm3223_vm6, %v1393_v7, %v1397_v55  ;;  %v550_v55 = vshrl.u32 %v2530_v35, 16  ;;  %v2945_v3 = vld [vmem:[#allocation2 + $0x360] ss:$8 sps:$4 sm:$0xff]   ;;  %v564_v7 = vshrl.u32 %v2531_v39, 16 }
  0x5b   :  { %770 = vmatprep.subr.bf16.mxu1 %v2920_v14  ;;  %1788 = vmatpush1.bf16.msra.mxu0 %v2915_v26  ;;  %v1437_v14 = vshll.u32 %v1328_v49, 16  ;;  %v1434_v21 = vor.u32 %v1433_v13, %v1430_v10  ;;  %v2958_v26 = vld [vmem:[#allocation2 + $0x184] ss:$8 sps:$4 sm:$0xff]   ;;  %v567_v10 = vshll.u32 %v2531_v39, 16 }
  0x5c   :  { %1789 = vmatprep.subr.bf16.mxu0 %v2923_v27  ;;  %v1421_v20 = vrot.slane %v1420_v11, 2  ;;  %v2529_v27 = vld.sshfl [vmem:[%s3413_s0 + $0x4] sm:$0x13 pattern:$0x76325410]  ;;  %v552_v62 = vrot.slane %v550_v55, 6 }
  0x5d   :  { %424 = vmatmul.mubr.bf16.gmra.mrb[4].mxu1 %v298_v43  ;;  %v1439_v22 = vrot.slane %v1437_v14, 7  ;;  %v1435_v33 = vrot.slane %v1434_v21, 2  ;;  %v465_v37 = vcombine.high %v2529_v27, %v2529_v27  ;;  %v536_v49 = vshrl.u32 %v2529_v27, 16 }
  0x5e   :  { %771 = vmatpush1.bf16.msra.mxu1 %v2918_v18  ;;  %798 = vmatprep.mubr.bf16.mxu1 %v3115_v0  ;;  %v2952_v18 = vld [vmem:[#allocation2 + $0x174] ss:$8 sps:$4 sm:$0xff]   ;;  %v539_v50 = vshll.u32 %v2529_v27, 16  ;;  %v573_v11 = vshll.u32 %v481_v45, 16  ;;  %v561_v14 = vrot.slane %v559_v1, 7 }
  0x5f   :  { %772 = vmatprep.subr.bf16.mxu1 %v2926_v19  ;;  %1790 = vmatpush1.bf16.msra.mxu0 %v2921_v38  ;;  %v2941_v19 = vld [vmem:[#allocation2 + $0x354] ss:$8 sps:$4 sm:$0xff]   ;;  %v2939_v38 = vld [vmem:[#allocation2 + $0x350] ss:$8 sps:$4 sm:$0xff]   ;;  %v1440_v43 = vsel %vm3223_vm6, %v1435_v33, %v1439_v22  ;;  %v2959_v27 = vld [vmem:[#allocation2 + $0x380] ss:$8 sps:$4 sm:$0xff]  }
  0x60   :  { %1791 = vmatprep.subr.bf16.mxu0 %v2929_v48  ;;  %v575_v22 = vrot.slane %v573_v11, 7  ;;  %v2956_v33 = vld [vmem:[#allocation2 + $0x180] ss:$8 sps:$4 sm:$0xff]  }
  0x61   :  { %v2532_v39 = vld.sshfl [vmem:[%s3413_s0 + $0x14] sm:$0x13 pattern:$0x76325410]  ;;  %v2973_v45 = vld [vmem:[#allocation2 + $0x3a0] ss:$8 sps:$4 sm:$0xff]  }
  0x62   :  { %773 = vmatpush1.bf16.msra.mxu1 %v2924_v24  ;;  %v2528_v24 = vld.sshfl [vmem:[%s3413_s0] sm:$0x13 pattern:$0x76325410] }
  0x63   :  { %774 = vmatprep.subr.bf16.mxu1 %v2932_v25  ;;  %1792 = vmatpush1.bf16.msra.mxu0 %v2927_v59  ;;  %v1412_v25 = vsel %vm3223_vm6, %v1407_v17, %v1411_v9  ;;  %v522_v30 = vshrl.u32 %v2528_v24, 16  ;;  %v525_v31 = vshll.u32 %v2528_v24, 16  ;;  %v538_v59 = vrot.slane %v536_v49, 6 }
  0x64   :  { %1793 = vmatprep.subr.bf16.mxu0 %v2935_v2  ;;  %v1475_v34 = vcombine.low %v1398_v16, %v1412_v25  ;;  %v3053_v2 = vld.sshfl [vmem:[%s3413_s0 + $0xc] sm:$0xf pattern:$0x76325410]  ;;  %v556_v9 = vor.u32 %v555_v63, %v552_v62  ;;  %v569_v17 = vrot.slane %v567_v10, 7  ;;  %v595_v49 = vshll.u32 %v2533_v40, 16 }
  0x65   :  { %v524_v41 = vrot.slane %v522_v30, 6  ;;  %v527_v42 = vrot.slane %v525_v31, 7  ;;  %v2969_v30 = vld [vmem:[#allocation2 + $0x394] ss:$8 sps:$4 sm:$0xff]  }
  0x66   :  { %775 = vmatpush1.bf16.msra.mxu1 %v2930_v29  ;;  %v457_v29 = vcombine.high %v2528_v24, %v2528_v24  ;;  %v1483_v44 = vrot.slane %v1475_v34, %v3157_v36  ;;  %v557_v16 = vrot.slane %v556_v9, 2  ;;  %v2967_v34 = vld [vmem:[#allocation2 + $0x390] ss:$8 sps:$4 sm:$0xff]   ;;  %v2987_v9 = vld [vmem:[#allocation2 + $0x3c4] ss:$8 sps:$4 sm:$0xff]  }
  0x67   :  { %776 = vmatprep.subr.bf16.mxu1 %v2938_v32  ;;  %v1426_v32 = vsel %vm3223_vm6, %v1421_v20, %v1425_v12  ;;  %1794 = vmatpush1.bf16.msra.mxu0 %v2933_v15  ;;  %v528_v48 = vor.u32 %v527_v42, %v524_v41  ;;  %v566_v15 = vrot.slane %v564_v7, 6  ;;  %v2961_v20 = vld [vmem:[#allocation2 + $0x384] ss:$8 sps:$4 sm:$0xff]   ;;  %v489_v41 = vcombine.high %v2532_v39, %v2532_v39 }
  0x68   :  { %v531_v46 = vshll.u32 %v457_v29, 16  ;;  %v1476_v47 = vcombine.low %v1426_v32, %v1440_v43  ;;  %1795 = vmatprep.subr.bf16.mxu0 %v2941_v19  ;;  %v3297_v24 = vsel %vm3223_vm6, %v557_v16, %v561_v14  ;;  %v578_v42 = vshrl.u32 %v2532_v39, 16  ;;  %v2978_v14 = vld [vmem:[#allocation2 + $0x1b4] ss:$8 sps:$4 sm:$0xff]  }
  0x69   :  { %v529_v58 = vrot.slane %v528_v48, 2  ;;  %v570_v21 = vor.u32 %v569_v17, %v566_v15  ;;  %v581_v43 = vshll.u32 %v2532_v39, 16  ;;  %v592_v48 = vshrl.u32 %v2533_v40, 16 }
  0x6a   :  { %777 = vmatpush1.bf16.msra.mxu1 %v2936_v54  ;;  %v533_v53 = vrot.slane %v531_v46, 7  ;;  %v545_v54 = vshll.u32 %v465_v37, 16  ;;  %v1490_v57 = vrot.slane %v1476_v47, %v3157_v36  ;;  %v2966_v37 = vld [vmem:[#allocation2 + $0x194] ss:$8 sps:$4 sm:$0xff]   ;;  %v497_v47 = vcombine.high %v2533_v40, %v2533_v40 }
  0x6b   :  { %778 = vmatprep.subr.bf16.mxu1 %v2944_v60  ;;  %v541_v60 = vrot.slane %v539_v50, 7  ;;  %1796 = vmatpush1.bf16.msra.mxu0 %v2939_v38  ;;  %v571_v25 = vrot.slane %v570_v21, 2  ;;  %v2975_v38 = vld [vmem:[#allocation2 + $0x3a4] ss:$8 sps:$4 sm:$0xff]   ;;  %v2964_v50 = vld [vmem:[#allocation2 + $0x190] ss:$8 sps:$4 sm:$0xff]  }
  0x6c   :  { %v1491_v4 = vcombine.low %v1483_v44, %v1490_v57  ;;  %1797 = vmatprep.subr.bf16.mxu0 %v2947_v51  ;;  %v534_v12 = vsel %vm3223_vm6, %v529_v58, %v533_v53  ;;  %v2534_v46 = vld.sshfl [vmem:[%s3413_s0 + $0x1c] sm:$0x13 pattern:$0x76325410]  ;;  %v583_v55 = vrot.slane %v581_v43, 7  ;;  %v587_v58 = vshll.u32 %v489_v41, 16 }
  0x6d   :  { %v542_v5 = vor.u32 %v541_v60, %v538_v59  ;;  %v3301_v29 = vsel %vm3223_vm6, %v571_v25, %v575_v22  ;;  %v2535_v51 = vld.sshfl [vmem:[%s3413_s0 + $0x20] sm:$0x13 pattern:$0x76325410]  ;;  %v505_v53 = vcombine.high %v2534_v46, %v2534_v46  ;;  %v594_v59 = vrot.slane %v592_v48, 6 }
  0x6e   :  { %779 = vmatpush1.bf16.msra.mxu1 %v2942_v6  ;;  %v547_v6 = vrot.slane %v545_v54, 7  ;;  %1617 = vmatmul.mubr.bf16.gmra.mrb[4].mxu0 %v1491_v4  ;;  %v651_v31 = vcombine.low %v3297_v24, %v3301_v29  ;;  %v580_v54 = vrot.slane %v578_v42, 6  ;;  %v513_v57 = vcombine.high %v2535_v51, %v2535_v51  ;;  %v2991_v42 = vld [vmem:[#allocation2 + $0x3d0] ss:$8 sps:$4 sm:$0xff]   ;;  %v2990_v48 = vld [vmem:[#allocation2 + $0x1d4] ss:$8 sps:$4 sm:$0xff]  }
  0x6f   :  { %780 = vmatprep.subr.bf16.mxu1 %v2952_v18  ;;  %v543_v13 = vrot.slane %v542_v5, 2  ;;  %1817 = vmatprep.mubr.bf16.mxu0 %v3115_v0  ;;  %v2953_v18 = vld [vmem:[#allocation2 + $0x370] ss:$8 sps:$4 sm:$0xff]   ;;  %v597_v60 = vrot.slane %v595_v49, 7  ;;  %v601_v63 = vshll.u32 %v497_v47, 16  ;;  %v606_v1 = vshrl.u32 %v2534_v46, 16 }
  0x70   :  { %1798 = vmatpush1.bf16.msra.mxu0 %v2945_v3  ;;  %v665_v35 = vrot.slane %v651_v31, %v3157_v36  ;;  %v584_v62 = vor.u32 %v583_v55, %v580_v54  ;;  %v2979_v3 = vld [vmem:[#allocation2 + $0x3b0] ss:$8 sps:$4 sm:$0xff]   ;;  %v589_v4 = vrot.slane %v587_v58, 7  ;;  %v620_v7 = vshrl.u32 %v2535_v51, 16  ;;  %v3001_v47 = vld [vmem:[#allocation2 + $0x3e4] ss:$8 sps:$4 sm:$0xff]  }
  0x71   :  { %v3292_v19 = vsel %vm3223_vm6, %v543_v13, %v547_v6  ;;  %1799 = vmatprep.subr.bf16.mxu0 %v2955_v8  ;;  %v598_v5 = vor.u32 %v597_v60, %v594_v59  ;;  %v615_v6 = vshll.u32 %v505_v53, 16  ;;  %v2970_v8 = vld [vmem:[#allocation2 + $0x1a0] ss:$8 sps:$4 sm:$0xff]   ;;  %v603_v11 = vrot.slane %v601_v63, 7  ;;  %v2976_v31 = vld [vmem:[#allocation2 + $0x1b0] ss:$8 sps:$4 sm:$0xff]  }
  0x72   :  { %781 = vmatpush1.bf16.msra.mxu1 %v2950_v23  ;;  %v650_v23 = vcombine.low %v534_v12, %v3292_v19  ;;  %v585_v10 = vrot.slane %v584_v62, 2  ;;  %v608_v12 = vrot.slane %v606_v1, 6  ;;  %v622_v17 = vrot.slane %v620_v7, 6  ;;  %v2996_v54 = vld [vmem:[#allocation2 + $0x1e4] ss:$8 sps:$4 sm:$0xff]  }
  0x73   :  { %977 = vmatprep.subr.bf16.mxu1 %v2958_v26  ;;  %v1685_v26 = vcombine.low %v3052_v61, %v3053_v2  ;;  %v2981_v61 = vld [vmem:[#allocation2 + $0x3b4] ss:$8 sps:$4 sm:$0xff]   ;;  %v609_v2 = vshll.u32 %v2534_v46, 16  ;;  %v599_v15 = vrot.slane %v598_v5, 2  ;;  %v617_v16 = vrot.slane %v615_v6, 7 }
  0x74   :  { %1800 = vmatpush1.bf16.msra.mxu0 %v2953_v18  ;;  %v658_v32 = vrot.slane %v650_v23, %v3157_v36  ;;  %v623_v18 = vshll.u32 %v2535_v51, 16  ;;  %v629_v21 = vshll.u32 %v513_v57, 16  ;;  %v590_v22 = vsel %vm3223_vm6, %v585_v10, %v589_v4  ;;  %v3056_v49 = vld.sshfl [vmem:[%s3413_s0 + $0x2c] sm:$0xf pattern:$0x76325410] }
  0x75   :  { %1996 = vmatprep.subr.bf16.mxu0 %v2961_v20  ;;  %v611_v13 = vrot.slane %v609_v2, 7  ;;  %v3325_v23 = vsel %vm3223_vm6, %v599_v15, %v603_v11  ;;  %v3057_v53 = vld.sshfl [vmem:[%s3413_s0 + $0x34] sm:$0xf pattern:$0x76325410] }
  0x76   :  { %v666_v44 = vcombine.low %v658_v32, %v665_v35  ;;  %v625_v25 = vrot.slane %v623_v18, 7  ;;  %v2985_v32 = vld [vmem:[#allocation2 + $0x3c0] ss:$8 sps:$4 sm:$0xff]   ;;  %v2984_v35 = vld [vmem:[#allocation2 + $0x1c4] ss:$8 sps:$4 sm:$0xff]   ;;  %v1896_v2 = vcombine.low %v3056_v49, %v3057_v53 }
  0x77   :  { %1818 = vmatmul.mubr.bf16.vlgmr.msra.gmra.mrb[0].mxu0 %v1685_v26  ;;  %v612_v20 = vor.u32 %v611_v13, %v608_v12  ;;  %v3054_v26 = vld.sshfl [vmem:[%s3413_s0 + $0x18] sm:$0xf pattern:$0x76325410]  ;;  %v2999_v55 = vld [vmem:[#allocation2 + $0x3e0] ss:$8 sps:$4 sm:$0xff]  }
  0x78   :  { %1997 = vmatpush1.bf16.msra.mxu0 %v2959_v27  ;;  %1827 = vmatprep.mubr.bf16.mxu0 %v3115_v0  ;;  %v3055_v27 = vld.sshfl [vmem:[%s3413_s0 + $0x20] sm:$0xf pattern:$0x76325410]  ;;  %v3007_v57 = vld [vmem:[#allocation2 + $0x3f4] ss:$8 sps:$4 sm:$0xff]  }
  0x79   :  { %1998 = vmatprep.subr.bf16.mxu0 %v2969_v30  ;;  %799 = vmatmul.mubr.bf16.vlgmr.msra.gmra.mrb[0].mxu1 %v666_v44  ;;  %v613_v30 = vrot.slane %v612_v20, 2  ;;  %v1702_v41 = vcombine.low %v3054_v26, %v3055_v27  ;;  %v2982_v44 = vld [vmem:[#allocation2 + $0x1c0] ss:$8 sps:$4 sm:$0xff]   ;;  %v3005_v58 = vld [vmem:[#allocation2 + $0x3f0] ss:$8 sps:$4 sm:$0xff]  }
  0x7a   :  { %978 = vmatpush1.bf16.msra.mxu1 %v2956_v33  ;;  %808 = vmatprep.mubr.bf16.mxu1 %v3115_v0  ;;  %v626_v33 = vor.u32 %v625_v25, %v622_v17  ;;  %v3058_v59 = vld.sshfl [vmem:[%s3413_s0 + $0x50] sm:$0xf pattern:$0x76325410]  ;;  %v3014_v62 = vld [vmem:[#allocation2 + $0x404] ss:$8 sps:$4 sm:$0xff]  }
  0x7b   :  { %979 = vmatprep.subr.bf16.mxu1 %v2966_v37  ;;  %v2993_v37 = vld [vmem:[#allocation2 + $0x3d4] ss:$8 sps:$4 sm:$0xff]   ;;  %v3336_v39 = vsel %vm3223_vm6, %v613_v30, %v617_v16  ;;  %v3060_v1 = vld.sshfl [vmem:[%s3413_s0 + $0x40] sm:$0xf pattern:$0x76325410] }
  0x7c   :  { %1999 = vmatpush1.bf16.msra.mxu0 %v2967_v34  ;;  %v631_v34 = vrot.slane %v629_v21, 7  ;;  %v627_v40 = vrot.slane %v626_v33, 2  ;;  %v3059_v60 = vld.sshfl [vmem:[%s3413_s0 + $0x58] sm:$0xf pattern:$0x76325410] }
  0x7d   :  { %2000 = vmatprep.subr.bf16.mxu0 %v2975_v38  ;;  %v667_v38 = vcombine.low %v590_v22, %v3325_v23  ;;  %v3004_v63 = vld [vmem:[#allocation2 + $0x1f4] ss:$8 sps:$4 sm:$0xff]   ;;  %v3012_v4 = vld [vmem:[#allocation2 + $0x400] ss:$8 sps:$4 sm:$0xff]   ;;  %v3002_v5 = vld [vmem:[#allocation2 + $0x1f0] ss:$8 sps:$4 sm:$0xff]  }
  0x7e   :  { %980 = vmatpush1.bf16.msra.mxu1 %v2964_v50  ;;  %v3340_v43 = vsel %vm3223_vm6, %v627_v40, %v631_v34  ;;  %v2988_v50 = vld [vmem:[#allocation2 + $0x1d0] ss:$8 sps:$4 sm:$0xff]   ;;  %v3017_v6 = vld [vmem:[#allocation2 + $0x414] ss:$8 sps:$4 sm:$0xff]   ;;  %v3022_v17 = vld [vmem:[#allocation2 + $0x420] ss:$8 sps:$4 sm:$0xff]  }
  0x7f   :  { %981 = vmatprep.subr.bf16.mxu1 %v2972_v56  ;;  %v675_v46 = vrot.slane %v667_v38, %v3157_v36  ;;  %1828 = vmatmul.mubr.bf16.gmra.mrb[4].mxu0 %v1702_v41  ;;  %v3015_v7 = vld [vmem:[#allocation2 + $0x410] ss:$8 sps:$4 sm:$0xff]   ;;  %v2695_v15 = vld.sshfl [vmem:[%s3413_s0 + $0x24] sm:$0x13 pattern:$0x76325410] }
  0x80   :  { %2001 = vmatpush1.bf16.msra.mxu0 %v2973_v45  ;;  %v668_v45 = vcombine.low %v3336_v39, %v3340_v43  ;;  %2028 = vmatprep.mubr.bf16.mxu0 %v3115_v0  ;;  %v3063_v10 = vld.sshfl [vmem:[%s3413_s0 + $0x6c] sm:$0xf pattern:$0x76325410]  ;;  %v3027_v22 = vld [vmem:[#allocation2 + $0x434] ss:$8 sps:$4 sm:$0xff]   ;;  %v2136_v34 = vcombine.high %v2695_v15, %v2695_v15 }
  0x81   :  { %2002 = vmatprep.subr.bf16.mxu0 %v2981_v61  ;;  %v2994_v61 = vld [vmem:[#allocation2 + $0x1e0] ss:$8 sps:$4 sm:$0xff]   ;;  %v2691_v11 = vld.sshfl [vmem:[%s3413_s0 + $0x10] sm:$0x13 pattern:$0x76325410] }
  0x82   :  { %982 = vmatpush1.bf16.msra.mxu1 %v2970_v8  ;;  %v682_v51 = vrot.slane %v668_v45, %v3157_v36  ;;  %v3062_v8 = vld.sshfl [vmem:[%s3413_s0 + $0x64] sm:$0xf pattern:$0x76325410]  ;;  %v2180_v12 = vshrl.u32 %v2691_v11, 16  ;;  %v2183_v13 = vshll.u32 %v2691_v11, 16  ;;  %v2104_v18 = vcombine.high %v2691_v11, %v2691_v11 }
  0x83   :  { %983 = vmatprep.subr.bf16.mxu1 %v2978_v14  ;;  %v3024_v14 = vld [vmem:[#allocation2 + $0x424] ss:$8 sps:$4 sm:$0xff]   ;;  %v2236_v25 = vshrl.u32 %v2695_v15, 16  ;;  %v2239_v26 = vshll.u32 %v2695_v15, 16  ;;  %v894_v27 = vcombine.low %v3062_v8, %v3063_v10  ;;  %v3025_v30 = vld [vmem:[#allocation2 + $0x430] ss:$8 sps:$4 sm:$0xff]  }
  0x84   :  { %2003 = vmatpush1.bf16.msra.mxu0 %v2979_v3  ;;  %v683_v56 = vcombine.low %v675_v46, %v682_v51  ;;  %v3061_v3 = vld.sshfl [vmem:[%s3413_s0 + $0x48] sm:$0xf pattern:$0x76325410]  ;;  %v2182_v20 = vrot.slane %v2180_v12, 6  ;;  %v2185_v21 = vrot.slane %v2183_v13, 7  ;;  %v2266_v51 = vcombine.low %v3292_v19, %v3297_v24 }
  0x85   :  { %2004 = vmatprep.subr.bf16.mxu0 %v2987_v9  ;;  %v877_v9 = vcombine.low %v3058_v59, %v3059_v60  ;;  %v1913_v16 = vcombine.low %v3060_v1, %v3061_v3  ;;  %v3030_v33 = vld [vmem:[#allocation2 + $0x444] ss:$8 sps:$4 sm:$0xff]   ;;  %v3028_v38 = vld [vmem:[#allocation2 + $0x440] ss:$8 sps:$4 sm:$0xff]   ;;  %v2245_v45 = vshll.u32 %v2136_v34, 16  ;;  %v2283_v19 = vcombine.low %v3325_v23, %v3336_v39 }
  0x86   :  { %984 = vmatpush1.bf16.msra.mxu1 %v2976_v31  ;;  %v2186_v31 = vor.u32 %v2185_v21, %v2182_v20  ;;  %v3031_v46 = vld [vmem:[#allocation2 + $0x450] ss:$8 sps:$4 sm:$0xff]   ;;  %v2447_v10 = vsub.s32 0, %v3154_v28  ;;  %v2443_v11 = vld [vmem:[%s3415_s2] sm:$0x3]  ;;  %v2451_v12 = vsub.s32 1, %v3154_v28 }
  0x87   :  { %985 = vmatprep.subr.bf16.mxu1 %v2984_v35  ;;  %809 = vmatmul.mubr.bf16.gmra.mrb[4].mxu1 %v683_v56  ;;  %v2238_v35 = vrot.slane %v2236_v25, 6  ;;  %v2274_v56 = vrot.slane %v2266_v51, %v3157_v36  ;;  %v2291_v52 = vrot.slane %v2283_v19, %v3157_v36  ;;  %s3117_s2 = smov [#allocation5]  }
  0x88   :  { %2005 = vmatpush1.bf16.msra.mxu0 %v2985_v32  ;;  %1009 = vmatprep.mubr.bf16.mxu1 %v3115_v0  ;;  %v2189_v32 = vshll.u32 %v2104_v18, 16  ;;  %v2187_v40 = vrot.slane %v2186_v31, 2  ;;  %v2448_v13 = vrot.slane %v2443_v11, %v2447_v10  ;;  %v2452_v15 = vrot.slane %v2443_v11, %v2451_v12  ;;  %s2476_s26 = sshll.u32 %s3117_s2, 4  ;;  %s2477_s26 = int_to_ptr.vmem [resolvable:$true] %s2476_s26 }
  0x89   :  { %2006 = vmatprep.subr.bf16.mxu0 %v2993_v37  ;;  %v2241_v37 = vrot.slane %v2239_v26, 7  ;;  %s3086_s27 = scalar_lea.vmem %s2477_s26, 1024  ;;  %p3091_p9 = scmp.lt.s32.totalorder %s2477_s26, %s2477_s26 }
  0x8a   :  { %986 = vmatpush1.bf16.msra.mxu1 %v2982_v44  ;;  %v2191_v41 = vrot.slane %v2189_v32, 7  ;;  %p3087_p8 = scmp.ne.s32.totalorder %s2477_s26, %s3086_s27  ;;  %p3092_p10 = scmp.lt.s32.totalorder %s3086_s27, %s3086_s27 }
  0x8b   :  { %987 = vmatprep.subr.bf16.mxu1 %v2990_v48  ;;  %v2242_v44 = vor.u32 %v2241_v37, %v2238_v35  ;;  %v3036_v48 = vld [vmem:[#allocation2 + $0x464] ss:$8 sps:$4 sm:$0xff]  }
  0x8c   :  { %2007 = vmatpush1.bf16.msra.mxu0 %v2991_v42  ;;  %v3033_v42 = vld [vmem:[#allocation2 + $0x454] ss:$8 sps:$4 sm:$0xff]   ;;  %p3093_p11 = por %p3092_p10, %p3091_p9 }
  0x8d   :  { %2008 = vmatprep.subr.bf16.mxu0 %v3001_v47  ;;  %v2192_v47 = vsel %vm3223_vm6, %v2187_v40, %v2191_v41  ;;  %v2243_v49 = vrot.slane %v2242_v44, 2 }
  0x8e   :  { %988 = vmatpush1.bf16.msra.mxu1 %v2988_v50  ;;  %v2247_v50 = vrot.slane %v2245_v45, 7  ;;  %v2267_v53 = vcombine.low %v3301_v29, %v2192_v47  ;;  %p3094_p12 = pnand %p3093_p11, %p3087_p8 }
  0x8f   :  { %989 = vmatprep.subr.bf16.mxu1 %v2996_v54  ;;  %v3034_v54 = vld [vmem:[#allocation2 + $0x460] ss:$8 sps:$4 sm:$0xff]  }
  0x90   :  { %2009 = vmatpush1.bf16.msra.mxu0 %v2999_v55  ;;  %v2248_v55 = vsel %vm3223_vm6, %v2243_v49, %v2247_v50 }
  0x91   :  { %2010 = vmatprep.subr.bf16.mxu0 %v3007_v57  ;;  %v2281_v57 = vrot.slane %v2267_v53, %v3157_v36  ;;  %v2284_v24 = vcombine.low %v3340_v43, %v2248_v55 }
  0x92   :  { %990 = vmatpush1.bf16.msra.mxu1 %v2994_v61 }
  0x93   :  { %991 = vmatprep.subr.bf16.mxu1 %v3004_v63  ;;  %v2282_v29 = vcombine.low %v2274_v56, %v2281_v57  ;;  %v2298_v59 = vrot.slane %v2284_v24, %v3157_v36 }
  0x94   :  { %2011 = vmatpush1.bf16.msra.mxu0 %v3005_v58  ;;  %v3037_v58 = vld [vmem:[#allocation2 + $0x470] ss:$8 sps:$4 sm:$0xff]  }
  0x95   :  { %2382 = vmatprep.subr.bf16.mxu0 %v3014_v62  ;;  %v2299_v60 = vcombine.low %v2291_v52, %v2298_v59 }
  0x96   :  { %992 = vmatpush1.bf16.msra.mxu1 %v3002_v5 }
  0x97   :  { %2029 = vmatmul.mubr.bf16.vlgmr.msra.gmra.mrb[0].mxu0 %v1896_v2  ;;  %2712 = vmatprep.subr.bf16.mxu1 %v3014_v62 }
  0x98   :  { %2383 = vmatpush1.bf16.msra.mxu0 %v3012_v4  ;;  %2038 = vmatprep.mubr.bf16.mxu0 %v3115_v0 }
  0x99   :  { %2384 = vmatprep.subr.bf16.mxu0 %v3017_v6  ;;  %1010 = vmatmul.mubr.bf16.vlgmr.msra.gmra.mrb[0].mxu1 %v877_v9 }
  0x9a   :  { %2720 = vmatpush1.bf16.msra.mxu1 %v3012_v4  ;;  %1019 = vmatprep.mubr.bf16.mxu1 %v3115_v0 }
  0x9b   :  { %2713 = vmatprep.subr.bf16.mxu1 %v3017_v6 }
  0x9c   :  { %2385 = vmatpush1.bf16.msra.mxu0 %v3015_v7 }
  0x9d   :  { %2386 = vmatprep.subr.bf16.mxu0 %v3024_v14 }
  0x9e   :  { %2721 = vmatpush1.bf16.msra.mxu1 %v3015_v7 }
  0x9f   :  { %2039 = vmatmul.mubr.bf16.gmra.mrb[4].mxu0 %v1913_v16  ;;  %2714 = vmatprep.subr.bf16.mxu1 %v3024_v14 }
  0xa0   :  { %2387 = vmatpush1.bf16.msra.mxu0 %v3022_v17  ;;  %2414 = vmatprep.mubr.bf16.mxu0 %v3115_v0 }
  0xa1   :  { %2388 = vmatprep.subr.bf16.mxu0 %v3027_v22  ;;  %1020 = vmatmul.mubr.bf16.gmra.mrb[4].mxu1 %v894_v27 }
  0xa2   :  { %2722 = vmatpush1.bf16.msra.mxu1 %v3022_v17  ;;  %2424 = vmatprep.mubr.bf16.mxu1 %v3115_v0  ;;  %v3039_v0 = vld [vmem:[#allocation2 + $0x474] ss:$8 sps:$4 sm:$0xff]  }
  0xa3   :  { %2715 = vmatprep.subr.bf16.mxu1 %v3027_v22 }
  0xa4   :  { %2389 = vmatpush1.bf16.msra.mxu0 %v3025_v30 }
  0xa5   :  { %2390 = vmatprep.subr.bf16.mxu0 %v3030_v33 }
  0xa6   :  { %2723 = vmatpush1.bf16.msra.mxu1 %v3025_v30 }
  0xa7   :  { %2716 = vmatprep.subr.bf16.mxu1 %v3030_v33 }
  0xa8   :  { %2391 = vmatpush1.bf16.msra.mxu0 %v3028_v38 }
  0xa9   :  { %2392 = vmatprep.subr.bf16.mxu0 %v3033_v42 }
  0xaa   :  { %2724 = vmatpush1.bf16.msra.mxu1 %v3028_v38 }
  0xab   :  { %2717 = vmatprep.subr.bf16.mxu1 %v3033_v42 }
  0xac   :  { %2393 = vmatpush1.bf16.msra.mxu0 %v3031_v46 }
  0xad   :  { %2394 = vmatprep.subr.bf16.mxu0 %v3036_v48 }
  0xae   :  { %2725 = vmatpush1.bf16.msra.mxu1 %v3031_v46 }
  0xaf   :  { %2718 = vmatprep.subr.bf16.mxu1 %v3036_v48 }
  0xb0   :  { %2395 = vmatpush1.bf16.msra.mxu0 %v3034_v54 }
  0xb1   :  { %2396 = vmatprep.subr.bf16.mxu0 %v3039_v0 }
  0xb2   :  { %2726 = vmatpush1.bf16.msra.mxu1 %v3034_v54 }
  0xb3   :  { %2719 = vmatprep.subr.bf16.mxu1 %v3039_v0 }
  0xb4   :  { %2397 = vmatpush1.bf16.msra.mxu0 %v3037_v58 }
  0xb6   :  { %2727 = vmatpush1.bf16.msra.mxu1 %v3037_v58 }
  0xb7   :  { %2415 = vmatmul.mubr.bf16.vlgmr.msra.gmra.mrb[0].mxu0 %v2282_v29 }
  0xb9   :  { %2425 = vmatmul.mubr.bf16.vlgmr.msra.gmra.mrb[8].mxu1 %v2299_v60 }
 0x16c   :  { %v1011_v61 = vpop.f32.mrb[0].mxu1 }
 0x16d   :  { %v1013_v62 = vpop.f32.mrb[1].mxu1 }
 0x16e   :  { %v1015_v23 = vpop.f32.mrb[2].mxu1 }
 0x16f   :  { %v1017_v39 = vpop.f32.mrb[3].mxu1 }
 0x172   :  { %v2040_v43 = vpop.f32.mrb[4].mxu0 }
 0x173   :  { %v2042_v63 = vpop.f32.mrb[5].mxu0 }
 0x174   :  { %v2044_v1 = vpop.f32.mrb[6].mxu0  ;;  %v1021_v3 = vpop.f32.mrb[4].mxu1 }
 0x175   :  { %v2046_v2 = vpop.f32.mrb[7].mxu0  ;;  %v2732_v4 = vadd.f32 %v2040_v43, %v1021_v3  ;;  %v1023_v5 = vpop.f32.mrb[5].mxu1 }
 0x176   :  { %v2734_v6 = vadd.f32 %v2042_v63, %v1023_v5  ;;  %v1025_v7 = vpop.f32.mrb[6].mxu1 }
 0x177   :  { %v2736_v36 = vadd.f32 %v2044_v1, %v1025_v7  ;;  %v1027_v8 = vpop.f32.mrb[7].mxu1 }
 0x178   :  { %v2738_v9 = vadd.f32 %v2046_v2, %v1027_v8 }
 0x18a   :  { %v2416_v14 = vpop.f32.mrb[0].mxu0 }
 0x18b   :  { %v2728_v16 = vadd.f32 %v2416_v14, %v1011_v61  ;;  %v2418_v17 = vpop.f32.mrb[1].mxu0 }
 0x18c   :  { %v2729_v18 = vadd.f32 %v2418_v17, %v1013_v62  ;;  %v2420_v20 = vpop.f32.mrb[2].mxu0  ;;  %v2426_v30 = vpop.f32.mrb[8].mxu1 }
 0x18d   :  { %v2455_v21 = vadd.f32 %v2728_v16, %v2448_v13  ;;  %v2730_v22 = vadd.f32 %v2420_v20, %v1015_v23  ;;  %v2422_v25 = vpop.f32.mrb[3].mxu0  ;;  %v2733_v32 = vadd.f32 %v2732_v4, %v2426_v30  ;;  %v2428_v33 = vpop.f32.mrb[9].mxu1 }
 0x18e   :  { %v2456_v26 = vadd.f32 %v2729_v18, %v2452_v15  ;;  %v2731_v27 = vadd.f32 %v2422_v25, %v1017_v39  ;;  %v2735_v28 = vadd.f32 %v2734_v6, %v2428_v33  ;;  %v2430_v35 = vpop.f32.mrb[10].mxu1 }
 0x18f   :  { %2463 = vst [vmem:[#allocation5] sm:$0xff] %v2455_v21  ;;  %v2457_v31 = vadd.f32 %v2730_v22, %v2448_v13  ;;  %v2459_v37 = vadd.f32 %v2733_v32, %v2448_v13  ;;  %v2737_v38 = vadd.f32 %v2736_v36, %v2430_v35  ;;  %v2432_v40 = vpop.f32.mrb[11].mxu1 }
 0x190   :  { %2464 = vst [vmem:[#allocation5 + $0x8] sm:$0xff] %v2456_v26  ;;  %v2458_v34 = vadd.f32 %v2731_v27, %v2452_v15  ;;  %v2460_v41 = vadd.f32 %v2735_v28, %v2452_v15  ;;  %v2739_v42 = vadd.f32 %v2738_v9, %v2432_v40 }
 0x191   :  { %2465 = vst [vmem:[#allocation5 + $0x10] sm:$0xff] %v2457_v31  ;;  %2467 = vst [vmem:[#allocation5 + $0x20] sm:$0xff] %v2459_v37  ;;  %v2461_v44 = vadd.f32 %v2737_v38, %v2448_v13 }
 0x192   :  { %2466 = vst [vmem:[#allocation5 + $0x18] sm:$0xff] %v2458_v34  ;;  %2468 = vst [vmem:[#allocation5 + $0x28] sm:$0xff] %v2460_v41  ;;  %v2462_v45 = vadd.f32 %v2739_v42, %v2452_v15 }
 0x193   :  { %2469 = vst [vmem:[#allocation5 + $0x30] sm:$0xff] %v2461_v44 }
 0x194   :  { %2470 = vst [vmem:[#allocation5 + $0x38] sm:$0xff] %v2462_v45 }
 0x195   :  { %3097 = shalt.err (!%p3094_p12)
}
 0x196   :  { %s3098_s30 = scalar_lea.hbm %s3416_s3, 1024 }
 0x197   :  { %p3099_p13 = scmp.ne.s32.totalorder %s3416_s3, %s3098_s30  ;;  %p3102_p0 = scmp.lt.u32.totalorder %s3098_s30, %s3416_s3 }
 0x199   :  { %p3104_p1 = pnand %p3102_p0, %p3099_p13 }
 0x19b   :  { %3107 = shalt.err (!%p3104_p1)
}
 0x19c   :  { %s3118_s8 = smov 256   ;;  %s3119_s9 = smov 16  }
 0x19d   :  { %2482 = dma.vmem_to_hbm [thread:$0]  %s2477_s26, 1024, %s3416_s3, [#allocation4], %s3118_s8, %s3118_s8, %s3119_s9  }
 0x19e   :  { %3110 = dma.done.wait [#allocation4], 1024  }
 0x19f   :  { %3111 = vsyncadd [#allocation4], 4294966272 }
 0x1a0   :  { %2486 = vsyncpa [#allocation3], 1 }
 0x1a1   :  { %2487 = vsyncpa [#allocation4], 1 }

</bundles_post_ra>
